<compile_context>
chip_gen: v6e
topology: v6e:2x2x1
jax: 0.10.0
libtpu: 0.0.40
codegen_flags: <defaults>
</compile_context>

<pallas_src>
import math

import jax
import jax.numpy as jnp
from jax import lax
from jax.experimental import pallas as pl
from jax.experimental.pallas import tpu as pltpu


def _round_up(x, m):
    return ((x + m - 1) // m) * m


def _vmem_capacity_bytes():
    """Physical VMEM of the current chip; fall back to v7x's 64 MiB (smallest)."""
    try:
        return int(pltpu.get_tpu_info().vmem_capacity_bytes)
    except Exception:
        return 64 * 1024 * 1024


def _make_linear_kernel(compute_dtype):
    def kernel(x_ref, w_ref, b_ref, o_ref):
        # x_ref: (tm, D) compute_dtype
        # w_ref: (tn, D) parameter dtype -- cast per tile (avoids a wrapper-side
        #        HBM round trip of the full V x D weight every call)
        # b_ref: (1, tn) f32
        # o_ref: (tm, tn) out dtype
        w = w_ref[...].astype(compute_dtype)
        # Contract the last dims directly (x @ W^T with W in (vocab, d_model)
        # layout): MXU consumes the transposed RHS natively, no XLU transpose.
        acc = lax.dot_general(
            x_ref[...],
            w,
            dimension_numbers=(((1,), (1,)), ((), ())),
            preferred_element_type=jnp.float32,
        )
        o_ref[...] = (acc + b_ref[...]).astype(o_ref.dtype)

    return kernel


def projection_layer(x, weight, bias, *, compute_dtype=jnp.bfloat16,
                     out_dtype=None, tm=None, tn=None):
    """x: (B, S, d_model); weight: (vocab, d_model); bias: (vocab,).

    Returns logits of shape (B, S, vocab) in `out_dtype` (default: x.dtype, i.e.
    the original nn.Linear semantics; pass jnp.bfloat16 to halve the logits
    HBM writeback for big-vocab LM heads).
    """
    B, S, D = x.shape
    V = weight.shape[0]
    M = B * S
    out_dtype = jnp.dtype(x.dtype) if out_dtype is None else jnp.dtype(out_dtype)

    x_bytes = jnp.dtype(compute_dtype).itemsize
    w_bytes = jnp.dtype(weight.dtype).itemsize
    o_bytes = out_dtype.itemsize

    # --- Chip-aware VMEM budget / tile selection -------------------------------
    vmem_cap = _vmem_capacity_bytes()
    # Headroom below physical capacity for compiler-internal scratch:
    #   v5e/v6e (128 MiB) -> 100 MiB limit, v7x (64 MiB) -> 48 MiB limit.
    vmem_limit = min(vmem_cap - 16 * 1024 * 1024, 100 * 1024 * 1024)
    tile_budget = vmem_limit - 4 * 1024 * 1024

    if tm is None:
        tm = min(256, _round_up(M, 16))     # small-M (decode) -> single resident x block
    else:
        tm = min(tm, _round_up(M, 16))

    if tn is None:
        tn = min(128, _round_up(V, 128))
        for cand in (2048, 1536, 1024, 768, 512, 384, 256, 128):
            c = min(cand, _round_up(V, 128))
            # Double-buffered x + weight + bias tiles plus the output tile.
            need = 2 * (tm * D * x_bytes + c * D * w_bytes + c * 4 + tm * c * o_bytes)
            if need <= tile_budget:
                tn = c
                break
    else:
        tn = min(tn, _round_up(V, 128))

    # --- Inputs: only x (small) is cast in the wrapper; weight stays as-is -----
    x2d = x.reshape(M, D).astype(compute_dtype)          # reshape is free; cast is tiny vs W
    b2d = bias.astype(jnp.float32).reshape(1, V)

    # Vocab-outer (j), M-inner (i): weight tile resident across the inner sweep.
    v_tiles = pl.cdiv(V, tn)
    m_tiles = pl.cdiv(M, tm)
    grid = (v_tiles, m_tiles)

    cost = pl.CostEstimate(
        flops=2 * M * V * D,
        transcendentals=0,
        bytes_accessed=int(M * D * x_bytes * v_tiles   # x re-streamed per vocab tile
                           + V * D * w_bytes           # weight read once
                           + V * 4                     # bias
                           + M * V * o_bytes),         # logits writeback
    )

    out2d = pl.pallas_call(
        _make_linear_kernel(compute_dtype),
        out_shape=jax.ShapeDtypeStruct((M, V), out_dtype),
        grid_spec=pltpu.PrefetchScalarGridSpec(
            num_scalar_prefetch=0,
            grid=grid,
            in_specs=[
                pl.BlockSpec((tm, D), lambda j, i: (i, 0)),   # x tile (resident if m_tiles==1)
                pl.BlockSpec((tn, D), lambda j, i: (j, 0)),   # weight tile (resident over i)
                pl.BlockSpec((1, tn), lambda j, i: (0, j)),   # bias tile
            ],
            out_specs=pl.BlockSpec((tm, tn), lambda j, i: (i, j)),
        ),
        compiler_params=pltpu.CompilerParams(
            # No cross-grid reduction; both axes independent.  On v7x the
            # vocab (outer) axis is the one we want sharded across the 2 TCs.
            dimension_semantics=("parallel", "parallel"),
            vmem_limit_bytes=int(vmem_limit),
        ),
        cost_estimate=cost,
    )(x2d, weight, b2d)

    return out2d.reshape(B, S, V)


if __name__ == "__main__":
    # Small shapes consistent with the module: (batch, seq, d_model) -> vocab.
    batch, seq, d_model, vocab_size = 2, 8, 32, 128

    key = jax.random.PRNGKey(0)
    kx, kw, kb = jax.random.split(key, 3)

    x = jax.random.normal(kx, (batch, seq, d_model), dtype=jnp.float32)

    # Deterministic init mimicking nn.Linear defaults (uniform +- 1/sqrt(fan_in)).
    bound = 1.0 / math.sqrt(d_model)
    weight = jax.random.uniform(kw, (vocab_size, d_model), jnp.float32, -bound, bound)
    bias = jax.random.uniform(kb, (vocab_size,), jnp.float32, -bound, bound)

    out = projection_layer(x, weight, bias)
    out = jax.block_until_ready(out)
    assert out.shape == (batch, seq, vocab_size)
    assert out.dtype == x.dtype

    # Tight check against matching bf16-input / f32-accumulate semantics.
    x2d = x.reshape(batch * seq, d_model)
    ref_bf16 = (
        jnp.dot(
            x2d.astype(jnp.bfloat16),
            weight.astype(jnp.bfloat16).T,
            preferred_element_type=jnp.float32,
        )
        + bias
    ).reshape(batch, seq, vocab_size)
    assert jnp.allclose(out, ref_bf16, atol=1e-4, rtol=1e-4), "bf16-path mismatch"

    # Loose check against the full-f32 nn.Linear semantics (matmul inputs are bf16).
    ref_f32 = x @ weight.T + bias
    assert jnp.allclose(out, ref_f32, atol=5e-2, rtol=5e-2), "f32 semantics drift"

    # Ragged shapes (non tile-divisible M and V) exercise the masked boundary
    # blocks -- no wrapper padding / output slicing anymore.
    b2, s2, v2 = 3, 5, 100
    x_r = jax.random.normal(kx, (b2, s2, d_model), dtype=jnp.float32)
    w_r = jax.random.uniform(kw, (v2, d_model), jnp.float32, -bound, bound)
    b_r = jax.random.uniform(kb, (v2,), jnp.float32, -bound, bound)
    out_r = jax.block_until_ready(projection_layer(x_r, w_r, b_r))
    assert out_r.shape == (b2, s2, v2)
    ref_r = (
        jnp.dot(
            x_r.reshape(-1, d_model).astype(jnp.bfloat16),
            w_r.astype(jnp.bfloat16).T,
            preferred_element_type=jnp.float32,
        )
        + b_r
    ).reshape(b2, s2, v2)
    assert jnp.allclose(out_r, ref_r, atol=1e-4, rtol=1e-4), "ragged-shape mismatch"

    print("KERNEL_OK")
</pallas_src>

<mosaic_0001>
module attributes {stable_mosaic.version = 11 : i64} {
  func.func @kernel(%arg0: i32, %arg1: i32, %arg2: memref<16x32xbf16, #tpu.memory_space<vmem>>, %arg3: memref<128x32xf32, #tpu.memory_space<vmem>>, %arg4: memref<1x128xf32, #tpu.memory_space<vmem>>, %arg5: memref<16x128xf32, #tpu.memory_space<vmem>>) attributes {dimension_semantics = [#tpu.dimension_semantics<parallel>, #tpu.dimension_semantics<parallel>], iteration_bounds = array<i64: 1, 1>, scalar_prefetch = 0 : i64, scratch_operands = 0 : i64, tpu.core_type = #tpu.core_type<tc>, window_params = [{transform_indices = @transform_0, window_bounds = array<i64: 16, 32>}, {transform_indices = @transform_1, window_bounds = array<i64: 128, 32>}, {transform_indices = @transform_2, window_bounds = array<i64: 1, 128>}, {transform_indices = @transform_3, window_bounds = array<i64: 16, 128>}]} {
    %c0 = arith.constant 0 : index
    %c0_0 = arith.constant 0 : index
    %0 = vector.load %arg3[%c0, %c0_0] : memref<128x32xf32, #tpu.memory_space<vmem>>, vector<128x32xf32>
    %1 = arith.truncf %0 : vector<128x32xf32> to vector<128x32xbf16>
    %c0_1 = arith.constant 0 : index
    %c0_2 = arith.constant 0 : index
    %2 = vector.load %arg2[%c0_1, %c0_2] : memref<16x32xbf16, #tpu.memory_space<vmem>>, vector<16x32xbf16>
    %cst = arith.constant dense<0.000000e+00> : vector<16x128xf32>
    %3 = tpu.matmul %2, %1, %cst {dimension_numbers = #tpu.dot_dimension_numbers<[1], [1], [0], [0], [0, 0, 1, 0], [], []>} : vector<16x32xbf16>, vector<128x32xbf16>, vector<16x128xf32> -> vector<16x128xf32>
    %c0_3 = arith.constant 0 : index
    %c0_4 = arith.constant 0 : index
    %4 = vector.load %arg4[%c0_3, %c0_4] : memref<1x128xf32, #tpu.memory_space<vmem>>, vector<1x128xf32>
    %5 = vector.broadcast %4 : vector<1x128xf32> to vector<16x128xf32>
    %6 = arith.addf %3, %5 : vector<16x128xf32>
    %c0_5 = arith.constant 0 : index
    %c0_6 = arith.constant 0 : index
    %7 = vector.load %arg5[%c0_5, %c0_6] : memref<16x128xf32, #tpu.memory_space<vmem>>, vector<16x128xf32>
    tpu.vector_store %arg5[%c0_5, %c0_6], %6 {strides = array<i32>} : memref<16x128xf32, #tpu.memory_space<vmem>>, vector<16x128xf32>,
    return
  }
  func.func @transform_0(%arg0: i32, %arg1: i32) -> (i32, i32) {
    %c0_i32 = arith.constant 0 : i32
    %c0_i32_0 = arith.constant 0 : i32
    return %arg1, %c0_i32 : i32, i32
  }
  func.func @transform_1(%arg0: i32, %arg1: i32) -> (i32, i32) {
    %c0_i32 = arith.constant 0 : i32
    %c0_i32_0 = arith.constant 0 : i32
    return %arg0, %c0_i32 : i32, i32
  }
  func.func @transform_2(%arg0: i32, %arg1: i32) -> (i32, i32) {
    %c0_i32 = arith.constant 0 : i32
    %c0_i32_0 = arith.constant 0 : i32
    return %c0_i32, %arg0 : i32, i32
  }
  func.func @transform_3(%arg0: i32, %arg1: i32) -> (i32, i32) {
    %c0_i32 = arith.constant 0 : i32
    return %arg1, %arg0 : i32, i32
  }
}

</mosaic_0001>

<bundles_post_ra>
// kernel: tpu_custom_call.1
= control target key start
LH: loop header
LB: loop body
LE: loop exit
PB: predicated region body
PF: predicated region fallthrough
CT: control target
= control target key end

     0   :  { %vm54_vm0 = vcmask 261120   ;;  %v201_v2 = vmov 0.0   ;;  %vm202_vm1 = vmmov 0   ;;  %s292_s0 = inlined_call_operand.vmem [shape: bf16[16,32], index: 0, kind: input, shape index: {}]   ;;  %s293_s1 = inlined_call_operand.vmem [shape: f32[128,32], index: 1, kind: input, shape index: {}]   ;;  %s294_s2 = inlined_call_operand.vmem [shape: f32[1,128], index: 2, kind: input, shape index: {}]   ;;  %s295_s3 = inlined_call_operand.hbm [shape: f32[16,128], index: 3, kind: output, shape index: {}]  }
   0x1   :  { %v30_v0 = vld [vmem:[%s293_s1 + $0x70] sm:$0xff]  ;;  %v31_v1 = vld [vmem:[%s293_s1 + $0x78] sm:$0xff]  ;;  %153 = vmatprep.subr.bf16.mxu0 %v201_v2  ;;  %169 = vmatprep.mubr.msk.bf16.mxu0 %vm202_vm1, %v201_v2  ;;  %v28_v4 = vld [vmem:[%s293_s1 + $0x60] sm:$0xff] }
   0x2   :  { %v39_v3 = vpack.c.bf16 %v31_v1, %v30_v0  ;;  %v29_v5 = vld [vmem:[%s293_s1 + $0x68] sm:$0xff] }
   0x3   :  { %v38_v7 = vpack.c.bf16 %v29_v5, %v28_v4 }
   0x4   :  { %v80_v6 = vsel %vm54_vm0, %v39_v3, 0 }
   0x5   :  { %154 = vmatpush3.bf16.xpose.msra.mxu0 %v80_v6 }
   0x6   :  { %155 = vmatprep.subr.bf16.mxu0 %v201_v2 }
   0x7   :  { %8 = vsyncpa [#allocation3], 0  ;;  %v77_v8 = vsel %vm54_vm0, %v38_v7, 0  ;;  %v26_v9 = vld [vmem:[%s293_s1 + $0x50] sm:$0xff]  ;;  %v27_v10 = vld [vmem:[%s293_s1 + $0x58] sm:$0xff]  ;;  %s203_s21 = smov [#allocation2]  }
   0x8   :  { %v37_v11 = vpack.c.bf16 %v27_v10, %v26_v9  ;;  %v24_v13 = vld [vmem:[%s293_s1 + $0x40] sm:$0xff]  ;;  %v25_v14 = vld [vmem:[%s293_s1 + $0x48] sm:$0xff]  ;;  %v22_v17 = vld [vmem:[%s293_s1 + $0x30] sm:$0xff] }
   0x9   :  { %v36_v15 = vpack.c.bf16 %v25_v14, %v24_v13  ;;  %v23_v18 = vld [vmem:[%s293_s1 + $0x38] sm:$0xff]  ;;  %v20_v21 = vld [vmem:[%s293_s1 + $0x20] sm:$0xff]  ;;  %v21_v22 = vld [vmem:[%s293_s1 + $0x28] sm:$0xff] }
   0xa   :  { %v74_v12 = vsel %vm54_vm0, %v37_v11, 0  ;;  %v35_v19 = vpack.c.bf16 %v23_v18, %v22_v17  ;;  %v34_v23 = vpack.c.bf16 %v21_v22, %v20_v21  ;;  %v18_v25 = vld [vmem:[%s293_s1 + $0x10] sm:$0xff]  ;;  %v19_v26 = vld [vmem:[%s293_s1 + $0x18] sm:$0xff]  ;;  %v16_v29 = vld [vmem:[%s293_s1] sm:$0xff] }
   0xb   :  { %v71_v16 = vsel %vm54_vm0, %v36_v15, 0  ;;  %v33_v27 = vpack.c.bf16 %v19_v26, %v18_v25  ;;  %v17_v30 = vld [vmem:[%s293_s1 + $0x8] sm:$0xff]  ;;  %v178_v33 = vld [vmem:[%s292_s0] sm:$0xff]   ;;  %s130_s1 = sshll.u32 %s203_s21, 4  ;;  %s131_s1 = int_to_ptr.vmem [resolvable:$true] %s130_s1 }
   0xc   :  { %v68_v20 = vsel %vm54_vm0, %v35_v19, 0  ;;  %v65_v24 = vsel %vm54_vm0, %v34_v23, 0  ;;  %v32_v31 = vpack.c.bf16 %v17_v30, %v16_v29  ;;  %v141_v34 = vld [vmem:[%s294_s2] ss:$0 sm:$0xff]  ;;  %s179_s22 = scalar_lea.vmem %s131_s1, 256  ;;  %p184_p1 = scmp.lt.s32.totalorder %s131_s1, %s131_s1 }
   0xd   :  { %156 = vmatpush3.bf16.xpose.msra.mxu0 %v77_v8  ;;  %v62_v28 = vsel %vm54_vm0, %v33_v27, 0  ;;  %p180_p0 = scmp.ne.s32.totalorder %s131_s1, %s179_s22  ;;  %p185_p2 = scmp.lt.s32.totalorder %s179_s22, %s179_s22 }
   0xe   :  { %157 = vmatprep.subr.bf16.mxu0 %v201_v2  ;;  %v59_v32 = vsel %vm54_vm0, %v32_v31, 0 }
   0xf   :  { %p186_p3 = por %p185_p2, %p184_p1 }
  0x11   :  { %p187_p4 = pnand %p186_p3, %p180_p0 }
  0x15   :  { %158 = vmatpush3.bf16.xpose.msra.mxu0 %v74_v12 }
  0x16   :  { %159 = vmatprep.subr.bf16.mxu0 %v201_v2 }
  0x1d   :  { %160 = vmatpush3.bf16.xpose.msra.mxu0 %v71_v16 }
  0x1e   :  { %161 = vmatprep.subr.bf16.mxu0 %v201_v2 }
  0x25   :  { %162 = vmatpush3.bf16.xpose.msra.mxu0 %v68_v20 }
  0x26   :  { %163 = vmatprep.subr.bf16.mxu0 %v201_v2 }
  0x2d   :  { %164 = vmatpush3.bf16.xpose.msra.mxu0 %v65_v24 }
  0x2e   :  { %165 = vmatprep.subr.bf16.mxu0 %v201_v2 }
  0x35   :  { %166 = vmatpush3.bf16.xpose.msra.mxu0 %v62_v28 }
  0x36   :  { %167 = vmatprep.subr.bf16.mxu0 %v201_v2 }
  0x3d   :  { %168 = vmatpush3.bf16.xpose.msra.mxu0 %v59_v32 }
  0x44   :  { %170 = vmatmul.mubr.msk.bf16.vlgmr.msra.gmra.mxu0 %vm54_vm0, %v178_v33 }
 0x104   :  { %v116_v35 = vpop.f32.mrf.mxu0 }
 0x105   :  { %v117_v36 = vadd.f32 %v141_v34, %v116_v35 }
 0x106   :  { %v171_v37 = vpop.f32.mrf.mxu0 }
 0x107   :  { %123 = vst [vmem:[#allocation2] sm:$0xff] %v117_v36 }
 0x108   :  { %v119_v38 = vpop.f32.mrf.mxu0 }
 0x109   :  { %v120_v39 = vadd.f32 %v141_v34, %v119_v38 }
 0x10a   :  { %v172_v40 = vpop.f32.mrf.mxu0 }
 0x10b   :  { %124 = vst [vmem:[#allocation2 + $0x8] sm:$0xff] %v120_v39 }
 0x10c   :  { %190 = shalt.err (!%p187_p4)
}
 0x10d   :  { %s204_s0 = smov 128   ;;  %s205_s2 = smov 8  }
 0x10e   :  { %136 = dma.vmem_to_hbm [thread:$0]  %s131_s1, 256, %s295_s3, [#allocation3], %s204_s0, %s204_s0, %s205_s2  }
 0x10f   :  { %199 = dma.done.wait [#allocation3], 256  }
 0x110   :  { %200 = vsyncadd [#allocation3], 4294967040 }
 0x111   :  { %140 = vsyncpa [#allocation3], 1 }

</bundles_post_ra>
